<compile_context>
chip_gen: v7x
topology: tpu7x:2x2x1
jax: 0.10.0
libtpu: 0.0.40
codegen_flags: <defaults>
</compile_context>

<pallas_src>
import functools

import jax
import jax.numpy as jnp
from jax.experimental import pallas as pl
from jax.experimental.pallas import tpu as pltpu

LANE = 128
SUBLANE = 8
IN_FEATURES = 28 * 28  # fixed by the module spec


def _round_up(x: int, m: int) -> int:
    return ((x + m - 1) // m) * m


# ----------------------------- Pallas kernel ------------------------------- #

def fused_mlp_kernel(x_ref, w1_ref, b1_ref, w2_ref, b2_ref, w3_ref, b3_ref, o_ref):
    # x_ref:  (TM, Kp)   bf16 flattened image tile (Kp = 896 = 7*128)
    # w1_ref: (Kp, H1p)  bf16 ; b1_ref: (1, H1p) f32
    # w2_ref: (H1p, H2p) bf16 ; b2_ref: (1, H2p) f32
    # w3_ref: (H2p, Cp)  bf16 ; b3_ref: (1, Cp)  f32   (Cp = num_classes padded to 128)
    # o_ref:  (TM, Cp)   f32
    #
    # Matmuls run on the MXU in bf16 with f32 accumulation; bias + ReLU stay in
    # f32 on the accumulator (v5e has no bf16 VPU path).
    h1 = jnp.dot(x_ref[...], w1_ref[...], preferred_element_type=jnp.float32)
    h1 = jnp.maximum(h1 + b1_ref[...], 0.0)

    h2 = jnp.dot(h1.astype(w2_ref.dtype), w2_ref[...],
                 preferred_element_type=jnp.float32)
    h2 = jnp.maximum(h2 + b2_ref[...], 0.0)

    o_ref[...] = jnp.dot(h2.astype(w3_ref.dtype), w3_ref[...],
                         preferred_element_type=jnp.float32) + b3_ref[...]


# --------------------- one-time parameter preparation ----------------------- #

def prepare_params(params, matmul_dtype=jnp.bfloat16):
    """Hoisted out of the hot path: transpose PyTorch (out,in) weights to (in,out),
    zero-pad every contraction/output dim to a multiple of 128 lanes, and cast
    the matmul operands to the MXU-native dtype.  Zero padding keeps the math
    exact.  Call once and reuse the result."""
    w1, b1 = params["w1"], params["b1"]   # (H1, 784), (H1,)
    w2, b2 = params["w2"], params["b2"]   # (H2, H1),  (H2,)
    w3, b3 = params["w3"], params["b3"]   # (C,  H2),  (C,)
    H1, H2, C = w1.shape[0], w2.shape[0], w3.shape[0]

    Kp = _round_up(IN_FEATURES, LANE)     # 784 -> 896
    H1p = _round_up(H1, LANE)
    H2p = _round_up(H2, LANE)             # 64 -> 128 (lane-dense intermediates)
    Cp = _round_up(C, LANE)               # 10 -> 128 (lane-dense output store)

    prep = {
        "w1": jnp.pad(w1.T, ((0, Kp - IN_FEATURES), (0, H1p - H1))).astype(matmul_dtype),
        "b1": jnp.pad(b1, (0, H1p - H1)).astype(jnp.float32)[None, :],
        "w2": jnp.pad(w2.T, ((0, H1p - H1), (0, H2p - H2))).astype(matmul_dtype),
        "b2": jnp.pad(b2, (0, H2p - H2)).astype(jnp.float32)[None, :],
        "w3": jnp.pad(w3.T, ((0, H2p - H2), (0, Cp - C))).astype(matmul_dtype),
        "b3": jnp.pad(b3, (0, Cp - C)).astype(jnp.float32)[None, :],
    }
    return prep, C


# ------------------------------- forward ------------------------------------ #

@functools.partial(jax.jit, static_argnames=("num_classes", "block_m"))
def forward(x, prep, *, num_classes, block_m=256):
    N = x.shape[0]
    Kp, H1p = prep["w1"].shape
    H2p = prep["w2"].shape[1]
    Cp = prep["w3"].shape[1]
    mm_dtype = prep["w1"].dtype

    # nn.Flatten() + cast to matmul dtype (per-call, input-only ops).
    xf = x.reshape(N, -1).astype(mm_dtype)
    K = xf.shape[1]

    # Batch tile: multiple of the f32 sublane (8), capped at block_m so the
    # per-step footprint (resident weights ~0.3 MB + double-buffered x/out
    # tiles + f32 intermediates) stays far under v7x's 32 MiB scoped VMEM.
    tm = min(block_m, _round_up(N, SUBLANE))
    n_pad = _round_up(N, tm)
    xpad = jnp.pad(xf, ((0, n_pad - N), (0, Kp - K)))   # zero pad: exact

    weight_bytes = sum(prep[k].size * prep[k].dtype.itemsize
                       for k in ("w1", "b1", "w2", "b2", "w3", "b3"))
    cost = pl.CostEstimate(
        flops=2 * n_pad * (Kp * H1p + H1p * H2p + H2p * Cp),
        transcendentals=0,
        bytes_accessed=xpad.size * xpad.dtype.itemsize + weight_bytes + n_pad * Cp * 4,
    )

    const = lambda i: (0, 0)   # weights stay resident across batch grid steps
    out_padded = pl.pallas_call(
        fused_mlp_kernel,
        out_shape=jax.ShapeDtypeStruct((n_pad, Cp), jnp.float32),
        grid=(n_pad // tm,),
        in_specs=[
            pl.BlockSpec((tm, Kp), lambda i: (i, 0)),   # x tile streams
            pl.BlockSpec((Kp, H1p), const),
            pl.BlockSpec((1, H1p), const),
            pl.BlockSpec((H1p, H2p), const),
            pl.BlockSpec((1, H2p), const),
            pl.BlockSpec((H2p, Cp), const),
            pl.BlockSpec((1, Cp), const),
        ],
        out_specs=pl.BlockSpec((tm, Cp), lambda i: (i, 0)),
        compiler_params=pltpu.CompilerParams(
            dimension_semantics=("parallel",),          # v7x: both TensorCores
            vmem_limit_bytes=32 * 1024 * 1024,
        ),
        cost_estimate=cost,
    )(xpad, prep["w1"], prep["b1"], prep["w2"], prep["b2"], prep["w3"], prep["b3"])

    return out_padded[:N, :num_classes]


# --------------------------- pure-JAX references ----------------------------- #

def reference_f32(x, params):
    xf = x.reshape(x.shape[0], -1)
    h1 = jax.nn.relu(xf @ params["w1"].T + params["b1"])
    h2 = jax.nn.relu(h1 @ params["w2"].T + params["b2"])
    return h2 @ params["w3"].T + params["b3"]


def reference_bf16(x, params):
    # Mirrors the kernel numerics: bf16 matmul operands, f32 accumulation,
    # bias/ReLU in f32.
    bf = jnp.bfloat16
    xf = x.reshape(x.shape[0], -1).astype(bf)
    h1 = jnp.maximum(jnp.dot(xf, params["w1"].T.astype(bf),
                             preferred_element_type=jnp.float32) + params["b1"], 0.0)
    h2 = jnp.maximum(jnp.dot(h1.astype(bf), params["w2"].T.astype(bf),
                             preferred_element_type=jnp.float32) + params["b2"], 0.0)
    return jnp.dot(h2.astype(bf), params["w3"].T.astype(bf),
                   preferred_element_type=jnp.float32) + params["b3"]


# ----------------------------------- main ----------------------------------- #

if __name__ == "__main__":
    # Small, deterministic config.  28*28 input is fixed by the module spec.
    batch, units1, units2, num_classes = 2, 128, 64, 10

    key = jax.random.PRNGKey(0)
    k_x, k1, k2, k3, k4, k5, k6 = jax.random.split(key, 7)

    x = jax.random.normal(k_x, (batch, 1, 28, 28), dtype=jnp.float32)

    params = {
        "w1": 0.05 * jax.random.normal(k1, (units1, 28 * 28), dtype=jnp.float32),
        "b1": 0.10 * jax.random.normal(k2, (units1,), dtype=jnp.float32),
        "w2": 0.10 * jax.random.normal(k3, (units2, units1), dtype=jnp.float32),
        "b2": 0.10 * jax.random.normal(k4, (units2,), dtype=jnp.float32),
        "w3": 0.15 * jax.random.normal(k5, (num_classes, units2), dtype=jnp.float32),
        "b3": 0.10 * jax.random.normal(k6, (num_classes,), dtype=jnp.float32),
    }

    # One-time parameter layout (transpose + pad + bf16), reused across calls.
    prep, n_classes = prepare_params(params)

    logits = jax.block_until_ready(forward(x, prep, num_classes=n_classes))

    assert logits.shape == (batch, num_classes), logits.shape

    # Tight check against a reference that mirrors the kernel numerics exactly.
    ref_bf = jax.block_until_ready(reference_bf16(x, params))
    assert jnp.allclose(logits, ref_bf, atol=2e-3, rtol=2e-3), (
        "mismatch vs bf16-mirrored reference:\n%r\nvs\n%r" % (logits, ref_bf))

    # Loose sanity check against the full-f32 module semantics (bf16 operands
    # introduce ~1e-2-scale rounding on these magnitudes).
    ref_f32 = jax.block_until_ready(reference_f32(x, params))
    assert jnp.allclose(logits, ref_f32, atol=1e-1, rtol=1e-1), (
        "mismatch vs f32 reference:\n%r\nvs\n%r" % (logits, ref_f32))

    print("KERNEL_OK")
</pallas_src>

<mosaic_0001>
module attributes {stable_mosaic.version = 11 : i64} {
  func.func @fused_mlp_kernel(%arg0: i32, %arg1: memref<8x896xbf16, #tpu.memory_space<vmem>>, %arg2: memref<896x128xbf16, #tpu.memory_space<vmem>>, %arg3: memref<1x128xf32, #tpu.memory_space<vmem>>, %arg4: memref<128x128xbf16, #tpu.memory_space<vmem>>, %arg5: memref<1x128xf32, #tpu.memory_space<vmem>>, %arg6: memref<128x128xbf16, #tpu.memory_space<vmem>>, %arg7: memref<1x128xf32, #tpu.memory_space<vmem>>, %arg8: memref<8x128xf32, #tpu.memory_space<vmem>>) attributes {dimension_semantics = [#tpu.dimension_semantics<parallel>], iteration_bounds = array<i64: 1>, scalar_prefetch = 0 : i64, scratch_operands = 0 : i64, tpu.core_type = #tpu.core_type<tc>, window_params = [{transform_indices = @transform_0, window_bounds = array<i64: 8, 896>}, {pipeline_mode = #tpu.pipeline_mode<synchronous>, transform_indices = @transform_1, window_bounds = array<i64: 896, 128>}, {pipeline_mode = #tpu.pipeline_mode<synchronous>, transform_indices = @transform_2, window_bounds = array<i64: 1, 128>}, {pipeline_mode = #tpu.pipeline_mode<synchronous>, transform_indices = @transform_3, window_bounds = array<i64: 128, 128>}, {pipeline_mode = #tpu.pipeline_mode<synchronous>, transform_indices = @transform_4, window_bounds = array<i64: 1, 128>}, {pipeline_mode = #tpu.pipeline_mode<synchronous>, transform_indices = @transform_5, window_bounds = array<i64: 128, 128>}, {pipeline_mode = #tpu.pipeline_mode<synchronous>, transform_indices = @transform_6, window_bounds = array<i64: 1, 128>}, {transform_indices = @transform_7, window_bounds = array<i64: 8, 128>}]} {
    %c0 = arith.constant 0 : index
    %c0_0 = arith.constant 0 : index
    %0 = vector.load %arg1[%c0, %c0_0] : memref<8x896xbf16, #tpu.memory_space<vmem>>, vector<8x896xbf16>
    %c0_1 = arith.constant 0 : index
    %c0_2 = arith.constant 0 : index
    %1 = vector.load %arg2[%c0_1, %c0_2] : memref<896x128xbf16, #tpu.memory_space<vmem>>, vector<896x128xbf16>
    %cst = arith.constant dense<0.000000e+00> : vector<8x128xf32>
    %2 = tpu.matmul %0, %1, %cst {dimension_numbers = #tpu.dot_dimension_numbers<[1], [0], [0], [1], [0, 0, 1, 1], [], []>} : vector<8x896xbf16>, vector<896x128xbf16>, vector<8x128xf32> -> vector<8x128xf32>
    %c0_3 = arith.constant 0 : index
    %c0_4 = arith.constant 0 : index
    %3 = vector.load %arg3[%c0_3, %c0_4] : memref<1x128xf32, #tpu.memory_space<vmem>>, vector<1x128xf32>
    %4 = vector.broadcast %3 : vector<1x128xf32> to vector<8x128xf32>
    %5 = arith.addf %2, %4 : vector<8x128xf32>
    %cst_5 = arith.constant 0.000000e+00 : f32
    %6 = vector.broadcast %cst_5 : f32 to vector<8x128xf32>
    %7 = arith.maximumf %5, %6 : vector<8x128xf32>
    %8 = arith.truncf %7 : vector<8x128xf32> to vector<8x128xbf16>
    %c0_6 = arith.constant 0 : index
    %c0_7 = arith.constant 0 : index
    %9 = vector.load %arg4[%c0_6, %c0_7] : memref<128x128xbf16, #tpu.memory_space<vmem>>, vector<128x128xbf16>
    %cst_8 = arith.constant dense<0.000000e+00> : vector<8x128xf32>
    %10 = tpu.matmul %8, %9, %cst_8 {dimension_numbers = #tpu.dot_dimension_numbers<[1], [0], [0], [1], [0, 0, 1, 1], [], []>} : vector<8x128xbf16>, vector<128x128xbf16>, vector<8x128xf32> -> vector<8x128xf32>
    %c0_9 = arith.constant 0 : index
    %c0_10 = arith.constant 0 : index
    %11 = vector.load %arg5[%c0_9, %c0_10] : memref<1x128xf32, #tpu.memory_space<vmem>>, vector<1x128xf32>
    %12 = vector.broadcast %11 : vector<1x128xf32> to vector<8x128xf32>
    %13 = arith.addf %10, %12 : vector<8x128xf32>
    %cst_11 = arith.constant 0.000000e+00 : f32
    %14 = vector.broadcast %cst_11 : f32 to vector<8x128xf32>
    %15 = arith.maximumf %13, %14 : vector<8x128xf32>
    %16 = arith.truncf %15 : vector<8x128xf32> to vector<8x128xbf16>
    %c0_12 = arith.constant 0 : index
    %c0_13 = arith.constant 0 : index
    %17 = vector.load %arg6[%c0_12, %c0_13] : memref<128x128xbf16, #tpu.memory_space<vmem>>, vector<128x128xbf16>
    %cst_14 = arith.constant dense<0.000000e+00> : vector<8x128xf32>
    %18 = tpu.matmul %16, %17, %cst_14 {dimension_numbers = #tpu.dot_dimension_numbers<[1], [0], [0], [1], [0, 0, 1, 1], [], []>} : vector<8x128xbf16>, vector<128x128xbf16>, vector<8x128xf32> -> vector<8x128xf32>
    %c0_15 = arith.constant 0 : index
    %c0_16 = arith.constant 0 : index
    %19 = vector.load %arg7[%c0_15, %c0_16] : memref<1x128xf32, #tpu.memory_space<vmem>>, vector<1x128xf32>
    %20 = vector.broadcast %19 : vector<1x128xf32> to vector<8x128xf32>
    %21 = arith.addf %18, %20 : vector<8x128xf32>
    %c0_17 = arith.constant 0 : index
    %c0_18 = arith.constant 0 : index
    %22 = vector.load %arg8[%c0_17, %c0_18] : memref<8x128xf32, #tpu.memory_space<vmem>>, vector<8x128xf32>
    tpu.vector_store %arg8[%c0_17, %c0_18], %21 {strides = array<i32>} : memref<8x128xf32, #tpu.memory_space<vmem>>, vector<8x128xf32>,
    return
  }
  func.func @transform_0(%arg0: i32) -> (i32, i32) {
    %c0_i32 = arith.constant 0 : i32
    %c0_i32_0 = arith.constant 0 : i32
    return %arg0, %c0_i32 : i32, i32
  }
  func.func @transform_1(%arg0: i32) -> (i32, i32) {
    %c0_i32 = arith.constant 0 : i32
    %c0_i32_0 = arith.constant 0 : i32
    %c0_i32_1 = arith.constant 0 : i32
    return %c0_i32, %c0_i32_0 : i32, i32
  }
  func.func @transform_2(%arg0: i32) -> (i32, i32) {
    %c0_i32 = arith.constant 0 : i32
    %c0_i32_0 = arith.constant 0 : i32
    %c0_i32_1 = arith.constant 0 : i32
    return %c0_i32, %c0_i32_0 : i32, i32
  }
  func.func @transform_3(%arg0: i32) -> (i32, i32) {
    %c0_i32 = arith.constant 0 : i32
    %c0_i32_0 = arith.constant 0 : i32
    %c0_i32_1 = arith.constant 0 : i32
    return %c0_i32, %c0_i32_0 : i32, i32
  }
  func.func @transform_4(%arg0: i32) -> (i32, i32) {
    %c0_i32 = arith.constant 0 : i32
    %c0_i32_0 = arith.constant 0 : i32
    %c0_i32_1 = arith.constant 0 : i32
    return %c0_i32, %c0_i32_0 : i32, i32
  }
  func.func @transform_5(%arg0: i32) -> (i32, i32) {
    %c0_i32 = arith.constant 0 : i32
    %c0_i32_0 = arith.constant 0 : i32
    %c0_i32_1 = arith.constant 0 : i32
    return %c0_i32, %c0_i32_0 : i32, i32
  }
  func.func @transform_6(%arg0: i32) -> (i32, i32) {
    %c0_i32 = arith.constant 0 : i32
    %c0_i32_0 = arith.constant 0 : i32
    %c0_i32_1 = arith.constant 0 : i32
    return %c0_i32, %c0_i32_0 : i32, i32
  }
  func.func @transform_7(%arg0: i32) -> (i32, i32) {
    %c0_i32 = arith.constant 0 : i32
    %c0_i32_0 = arith.constant 0 : i32
    return %arg0, %c0_i32 : i32, i32
  }
}

</mosaic_0001>

<bundles_post_ra>
// kernel: forward.1
= control target key start
LH: loop header
LB: loop body
LE: loop exit
PB: predicated region body
PF: predicated region fallthrough
CT: control target
= control target key end

     0   :  { %12 = vsyncpa [#allocation3], 0  ;;  %s1260_s24 = smov [#allocation2]   ;;  %s1419_s0 = inlined_call_operand.vmem [shape: bf16[8,896], index: 0, kind: input, shape index: {}]   ;;  %s1420_s1 = inlined_call_operand.hbm [shape: bf16[896,128], index: 1, kind: input, shape index: {}]   ;;  %s1421_s2 = inlined_call_operand.vmem [shape: f32[1,128], index: 2, kind: input, shape index: {}]   ;;  %s1422_s3 = inlined_call_operand.vmem [shape: bf16[128,128], index: 3, kind: input, shape index: {}]   ;;  %s1423_s4 = inlined_call_operand.vmem [shape: f32[1,128], index: 4, kind: input, shape index: {}]   ;;  %s1424_s5 = inlined_call_operand.vmem [shape: bf16[128,128], index: 5, kind: input, shape index: {}]   ;;  %s1425_s6 = inlined_call_operand.vmem [shape: f32[1,128], index: 6, kind: input, shape index: {}]   ;;  %s1426_s7 = inlined_call_operand.vmem [shape: f32[8,128], index: 7, kind: output, shape index: {}]  }
   0x1   :  { %s20_s25 = sshll.u32 %s1260_s24, 4  ;;  %s1236_s28 = scalar_lea.hbm %s1420_s1, 7168  ;;  %s21_s25 = int_to_ptr.vmem [resolvable:$true] %s20_s25 }
   0x2   :  { %p1237_p0 = scmp.ne.s32.totalorder %s1420_s1, %s1236_s28  ;;  %p1240_p1 = scmp.lt.u32.totalorder %s1236_s28, %s1420_s1 }
   0x4   :  { %p1242_p2 = pnand %p1240_p1, %p1237_p0 }
   0x6   :  { %1245 = shalt.err (!%p1242_p2)
}
   0x7   :  { %s1246_s10 = scalar_lea.vmem %s21_s25, 7168  ;;  %p1251_p4 = scmp.lt.s32.totalorder %s21_s25, %s21_s25 }
   0x8   :  { %p1247_p3 = scmp.ne.s32.totalorder %s21_s25, %s1246_s10  ;;  %p1252_p5 = scmp.lt.s32.totalorder %s1246_s10, %s1246_s10 }
   0xa   :  { %p1253_p6 = por %p1252_p5, %p1251_p4 }
   0xc   :  { %p1254_p7 = pnand %p1253_p6, %p1247_p3 }
   0xe   :  { %1257 = shalt.err (!%p1254_p7)
}
   0xf   :  { %s1261_s11 = smov 64   ;;  %s1262_s12 = smov 4  }
  0x10   :  { %26 = dma.hbm_to_vmem [thread:$0]  %s1420_s1, 7168, %s21_s25, [#allocation3], %s1261_s11, %s1261_s11, %s1262_s12  }
  0x11   :  { %1258 = dma.done.wait [#allocation3], 7168  }
  0x12   :  { %1259 = vsyncadd [#allocation3], 4294960128  ;;  %v1157_v0 = vld [vmem:[#allocation2 + $0x40] sm:$0xff]   ;;  %v1161_v4 = vld [vmem:[#allocation2 + $0x48] sm:$0xff]   ;;  %v1263_v42 = vmov 0.0   ;;  %vm1264_vm0 = vmmov 0  }
  0x13   :  { %v1158_v1 = vld [vmem:[#allocation2] sm:$0xff]   ;;  %999 = vmatprep.subr.bf16.mxu0 %v1157_v0  ;;  %v1162_v5 = vld [vmem:[#allocation2 + $0x8] sm:$0xff]   ;;  %v1165_v8 = vld [vmem:[#allocation2 + $0x50] sm:$0xff]  }
  0x14   :  { %v1159_v2 = vld [vmem:[#allocation2 + $0xc0] sm:$0xff]   ;;  %1000 = vmatpush3.bf16.msra.mxu0 %v1158_v1  ;;  %v1163_v6 = vld [vmem:[#allocation2 + $0xc8] sm:$0xff]   ;;  %v1166_v9 = vld [vmem:[#allocation2 + $0x10] sm:$0xff]  }
  0x15   :  { %v1160_v3 = vld [vmem:[#allocation2 + $0x80] sm:$0xff]   ;;  %1021 = vmatprep.subr.bf16.mxu1 %v1159_v2  ;;  %1001 = vmatprep.subr.bf16.mxu0 %v1161_v4  ;;  %v1164_v7 = vld [vmem:[#allocation2 + $0x88] sm:$0xff]   ;;  %v1167_v10 = vld [vmem:[#allocation2 + $0xd0] sm:$0xff]  }
  0x16   :  { %1022 = vmatpush3.bf16.msra.mxu1 %v1160_v3  ;;  %v1168_v11 = vld [vmem:[#allocation2 + $0x90] sm:$0xff]   ;;  %v1169_v12 = vld [vmem:[#allocation2 + $0x58] sm:$0xff]   ;;  %v1173_v16 = vld [vmem:[#allocation2 + $0x60] sm:$0xff]  }
  0x17   :  { %1023 = vmatprep.subr.bf16.mxu1 %v1163_v6  ;;  %v1170_v13 = vld [vmem:[#allocation2 + $0x18] sm:$0xff]   ;;  %v1174_v17 = vld [vmem:[#allocation2 + $0x20] sm:$0xff]   ;;  %v1177_v20 = vld [vmem:[#allocation2 + $0x68] sm:$0xff]  }
  0x18   :  { %1002 = vmatpush3.bf16.msra.mxu0 %v1162_v5  ;;  %v1171_v14 = vld [vmem:[#allocation2 + $0xd8] sm:$0xff]   ;;  %v1175_v18 = vld [vmem:[#allocation2 + $0xe0] sm:$0xff]   ;;  %v1178_v21 = vld [vmem:[#allocation2 + $0x28] sm:$0xff]  }
  0x19   :  { %1003 = vmatprep.subr.bf16.mxu0 %v1165_v8  ;;  %v1172_v15 = vld [vmem:[#allocation2 + $0x98] sm:$0xff]   ;;  %v1176_v19 = vld [vmem:[#allocation2 + $0xa0] sm:$0xff]   ;;  %v1179_v22 = vld [vmem:[#allocation2 + $0xe8] sm:$0xff]  }
  0x1a   :  { %1024 = vmatpush3.bf16.msra.mxu1 %v1164_v7  ;;  %v1180_v23 = vld [vmem:[#allocation2 + $0xa8] sm:$0xff]   ;;  %v1181_v24 = vld [vmem:[#allocation2 + $0x70] sm:$0xff]   ;;  %v1185_v28 = vld [vmem:[#allocation2 + $0x78] sm:$0xff]  }
  0x1b   :  { %1025 = vmatprep.subr.bf16.mxu1 %v1167_v10  ;;  %v1182_v25 = vld [vmem:[#allocation2 + $0x30] sm:$0xff]   ;;  %v1186_v29 = vld [vmem:[#allocation2 + $0x38] sm:$0xff]   ;;  %v41_v31 = vld [vmem:[%s1419_s0] sm:$0xff] }
  0x1c   :  { %1004 = vmatpush3.bf16.msra.mxu0 %v1166_v9  ;;  %v1183_v26 = vld [vmem:[#allocation2 + $0xf0] sm:$0xff]   ;;  %v1187_v30 = vld [vmem:[#allocation2 + $0xf8] sm:$0xff]   ;;  %v918_v32 = vcombine.low %v41_v31, %v41_v31  ;;  %v919_v33 = vcombine.high %v41_v31, %v41_v31  ;;  %v1191_v35 = vld [vmem:[#allocation2 + $0x140] sm:$0xff]  }
  0x1d   :  { %1005 = vmatprep.subr.bf16.mxu0 %v1169_v12  ;;  %v1184_v27 = vld [vmem:[#allocation2 + $0xb0] sm:$0xff]   ;;  %v1190_v34 = vld [vmem:[#allocation2 + $0xb8] sm:$0xff]   ;;  %v42_v36 = vld [vmem:[%s1419_s0 + $0x8] sm:$0xff] }
  0x1e   :  { %1026 = vmatpush3.bf16.msra.mxu1 %v1168_v11  ;;  %557 = vmatprep.mubr.bf16.mxu0 %v919_v33  ;;  %v920_v37 = vcombine.low %v42_v36, %v42_v36  ;;  %v921_v38 = vcombine.high %v42_v36, %v42_v36  ;;  %v1194_v39 = vld [vmem:[#allocation2 + $0x100] sm:$0xff]   ;;  %v1196_v41 = vld [vmem:[#allocation2 + $0x148] sm:$0xff]   ;;  %v1199_v45 = vld [vmem:[#allocation2 + $0x150] sm:$0xff]  }
  0x1f   :  { %1027 = vmatprep.subr.bf16.mxu1 %v1171_v14  ;;  %v1195_v40 = vld [vmem:[#allocation2 + $0x180] sm:$0xff]   ;;  %v1197_v43 = vld [vmem:[#allocation2 + $0x108] sm:$0xff]   ;;  %v1200_v46 = vld [vmem:[#allocation2 + $0x110] sm:$0xff]  }
  0x20   :  { %1006 = vmatpush3.bf16.msra.mxu0 %v1170_v13  ;;  %597 = vmatprep.mubr.bf16.mxu1 %v921_v38  ;;  %v1198_v44 = vld [vmem:[#allocation2 + $0x188] sm:$0xff]   ;;  %v1201_v47 = vld [vmem:[#allocation2 + $0x190] sm:$0xff]   ;;  %v1202_v48 = vld [vmem:[#allocation2 + $0x158] sm:$0xff]  }
  0x21   :  { %1007 = vmatprep.subr.bf16.mxu0 %v1173_v16  ;;  %v1203_v49 = vld [vmem:[#allocation2 + $0x118] sm:$0xff]   ;;  %v1205_v50 = vld [vmem:[#allocation2 + $0x160] sm:$0xff]   ;;  %v1208_v53 = vld [vmem:[#allocation2 + $0x168] sm:$0xff]  }
  0x22   :  { %1028 = vmatpush3.bf16.msra.mxu1 %v1172_v15  ;;  %v1204_v51 = vld [vmem:[#allocation2 + $0x198] sm:$0xff]   ;;  %v1206_v52 = vld [vmem:[#allocation2 + $0x120] sm:$0xff]   ;;  %v1209_v55 = vld [vmem:[#allocation2 + $0x128] sm:$0xff]  }
  0x23   :  { %1029 = vmatprep.subr.bf16.mxu1 %v1175_v18  ;;  %v1207_v54 = vld [vmem:[#allocation2 + $0x1a0] sm:$0xff]   ;;  %v1211_v56 = vld [vmem:[#allocation2 + $0x170] sm:$0xff]   ;;  %v1210_v57 = vld [vmem:[#allocation2 + $0x1a8] sm:$0xff]  }
  0x24   :  { %1008 = vmatpush3.bf16.msra.mxu0 %v1174_v17  ;;  %v1212_v58 = vld [vmem:[#allocation2 + $0x130] sm:$0xff]   ;;  %v1214_v62 = vld [vmem:[#allocation2 + $0x178] sm:$0xff]   ;;  %v1220_v3 = vld [vmem:[%s1422_s3] sm:$0xff]  }
  0x25   :  { %1009 = vmatprep.subr.bf16.mxu0 %v1177_v20  ;;  %v43_v59 = vld [vmem:[%s1419_s0 + $0x10] sm:$0xff]  ;;  %v1215_v63 = vld [vmem:[#allocation2 + $0x138] sm:$0xff]   ;;  %v1221_v4 = vld [vmem:[%s1422_s3 + $0x8] sm:$0xff]  }
  0x26   :  { %1030 = vmatpush3.bf16.msra.mxu1 %v1176_v19  ;;  %v1213_v60 = vld [vmem:[#allocation2 + $0x1b0] sm:$0xff]   ;;  %v923_v61 = vcombine.high %v43_v59, %v43_v59  ;;  %v1218_v0 = vld [vmem:[#allocation2 + $0x1b8] sm:$0xff]   ;;  %v922_v1 = vcombine.low %v43_v59, %v43_v59  ;;  %v1224_v7 = vld [vmem:[%s1422_s3 + $0x20] sm:$0xff]  }
  0x27   :  { %1031 = vmatprep.subr.bf16.mxu1 %v1179_v22  ;;  %v1219_v2 = vld [vmem:[%s1419_s0 + $0x18] ss:$0 sps:$4 sm:$0xff]   ;;  %v1222_v5 = vld [vmem:[%s1422_s3 + $0x10] sm:$0xff]   ;;  %v1225_v8 = vld [vmem:[%s1422_s3 + $0x28] sm:$0xff]  }
  0x28   :  { %1010 = vmatpush3.bf16.msra.mxu0 %v1178_v21  ;;  %v1223_v6 = vld [vmem:[%s1422_s3 + $0x18] sm:$0xff]   ;;  %v1226_v9 = vld [vmem:[%s1422_s3 + $0x30] sm:$0xff]   ;;  %v1228_v11 = vld [vmem:[%s1424_s5] sm:$0xff]  }
  0x29   :  { %1011 = vmatprep.subr.bf16.mxu0 %v1181_v24  ;;  %v1227_v10 = vld [vmem:[%s1422_s3 + $0x38] sm:$0xff]   ;;  %v1229_v12 = vld [vmem:[%s1424_s5 + $0x8] sm:$0xff]   ;;  %v1230_v13 = vld [vmem:[%s1424_s5 + $0x10] sm:$0xff]  }
  0x2a   :  { %1032 = vmatpush3.bf16.msra.mxu1 %v1180_v23  ;;  %v1231_v14 = vld [vmem:[%s1424_s5 + $0x18] sm:$0xff]   ;;  %v1232_v15 = vld [vmem:[%s1424_s5 + $0x20] sm:$0xff]   ;;  %v1233_v16 = vld [vmem:[%s1424_s5 + $0x28] sm:$0xff]  }
  0x2b   :  { %1033 = vmatprep.subr.bf16.mxu1 %v1183_v26  ;;  %v917_v18 = vld [vmem:[%s1421_s2] ss:$0 sm:$0xff] }
  0x2c   :  { %1012 = vmatpush3.bf16.msra.mxu0 %v1182_v25 }
  0x2d   :  { %1013 = vmatprep.subr.bf16.mxu0 %v1185_v28 }
  0x2e   :  { %1034 = vmatpush3.bf16.msra.mxu1 %v1184_v27 }
  0x2f   :  { %1035 = vmatprep.subr.bf16.mxu1 %v1187_v30 }
  0x30   :  { %1014 = vmatpush3.bf16.msra.mxu0 %v1186_v29 }
  0x31   :  { %1043 = vmatprep.subr.bf16.mxu0 %v1191_v35 }
  0x32   :  { %1036 = vmatpush3.bf16.msra.mxu1 %v1190_v34 }
  0x33   :  { %558 = vmatmul.mubr.bf16.vlgmr.msra.gmra.mrb[0].mxu0 %v918_v32  ;;  %1092 = vmatprep.subr.bf16.mxu1 %v1263_v42 }
  0x34   :  { %1044 = vmatpush3.bf16.msra.mxu0 %v1194_v39  ;;  %637 = vmatprep.mubr.bf16.mxu0 %v923_v61 }
  0x35   :  { %598 = vmatmul.mubr.bf16.vlgmr.msra.gmra.mrb[0].mxu1 %v920_v37  ;;  %1045 = vmatprep.subr.bf16.mxu0 %v1196_v41 }
  0x36   :  { %1093 = vmatpush3.bf16.msra.mxu1 %v1195_v40  ;;  %1108 = vmatprep.mubr.msk.bf16.mxu1 %vm1264_vm0, %v1263_v42 }
  0x37   :  { %1094 = vmatprep.subr.bf16.mxu1 %v1263_v42 }
  0x38   :  { %1046 = vmatpush3.bf16.msra.mxu0 %v1197_v43 }
  0x39   :  { %1047 = vmatprep.subr.bf16.mxu0 %v1199_v45  ;;  %v1235_v45 = vld [vmem:[%s1424_s5 + $0x38] sm:$0xff]  }
  0x3a   :  { %1095 = vmatpush3.bf16.msra.mxu1 %v1198_v44  ;;  %v1234_v44 = vld [vmem:[%s1424_s5 + $0x30] sm:$0xff]  }
  0x3b   :  { %1096 = vmatprep.subr.bf16.mxu1 %v1263_v42 }
  0x3c   :  { %1048 = vmatpush3.bf16.msra.mxu0 %v1200_v46  ;;  %v981_v46 = vld [vmem:[%s1423_s4] ss:$0 sm:$0xff] }
  0x3d   :  { %1049 = vmatprep.subr.bf16.mxu0 %v1202_v48 }
  0x3e   :  { %1097 = vmatpush3.bf16.msra.mxu1 %v1201_v47 }
  0x3f   :  { %1098 = vmatprep.subr.bf16.mxu1 %v1263_v42 }
  0x40   :  { %1050 = vmatpush3.bf16.msra.mxu0 %v1203_v49 }
  0x41   :  { %1051 = vmatprep.subr.bf16.mxu0 %v1205_v50 }
  0x42   :  { %1099 = vmatpush3.bf16.msra.mxu1 %v1204_v51 }
  0x43   :  { %1100 = vmatprep.subr.bf16.mxu1 %v1263_v42 }
  0x44   :  { %1052 = vmatpush3.bf16.msra.mxu0 %v1206_v52 }
  0x45   :  { %1053 = vmatprep.subr.bf16.mxu0 %v1208_v53 }
  0x46   :  { %1101 = vmatpush3.bf16.msra.mxu1 %v1207_v54 }
  0x47   :  { %1102 = vmatprep.subr.bf16.mxu1 %v1263_v42 }
  0x48   :  { %1054 = vmatpush3.bf16.msra.mxu0 %v1209_v55 }
  0x49   :  { %1055 = vmatprep.subr.bf16.mxu0 %v1211_v56 }
  0x4a   :  { %1103 = vmatpush3.bf16.msra.mxu1 %v1210_v57 }
  0x4b   :  { %1104 = vmatprep.subr.bf16.mxu1 %v1263_v42 }
  0x4c   :  { %1056 = vmatpush3.bf16.msra.mxu0 %v1212_v58 }
  0x4d   :  { %1057 = vmatprep.subr.bf16.mxu0 %v1214_v62 }
  0x4e   :  { %1105 = vmatpush3.bf16.msra.mxu1 %v1213_v60 }
  0x4f   :  { %1106 = vmatprep.subr.bf16.mxu1 %v1263_v42 }
  0x50   :  { %1058 = vmatpush3.bf16.msra.mxu0 %v1215_v63 }
  0x51   :  { %1112 = vmatprep.subr.bf16.mxu0 %v1263_v42 }
  0x52   :  { %1107 = vmatpush3.bf16.msra.mxu1 %v1218_v0 }
  0x53   :  { %638 = vmatmul.mubr.bf16.vlgmr.msra.gmra.mrb[4].mxu0 %v922_v1  ;;  %1132 = vmatprep.subr.bf16.mxu1 %v1263_v42 }
  0x54   :  { %1128 = vmatprep.mubr.msk.bf16.mxu0 %vm1264_vm0, %v1263_v42  ;;  %1113 = vmatpush3.bf16.msra.mxu0 %v1220_v3 }
  0x55   :  { %1109 = vmatmul.mubr.bf16.vlgmr.msra.gmra.mrb[4].mxu1 %v1219_v2  ;;  %1114 = vmatprep.subr.bf16.mxu0 %v1263_v42 }
  0x56   :  { %1148 = vmatprep.mubr.msk.bf16.mxu1 %vm1264_vm0, %v1263_v42  ;;  %1133 = vmatpush3.bf16.msra.mxu1 %v1228_v11 }
  0x57   :  { %1134 = vmatprep.subr.bf16.mxu1 %v1263_v42 }
  0x58   :  { %1115 = vmatpush3.bf16.msra.mxu0 %v1221_v4 }
  0x59   :  { %1116 = vmatprep.subr.bf16.mxu0 %v1263_v42 }
  0x5a   :  { %1135 = vmatpush3.bf16.msra.mxu1 %v1229_v12 }
  0x5b   :  { %1136 = vmatprep.subr.bf16.mxu1 %v1263_v42 }
  0x5c   :  { %1117 = vmatpush3.bf16.msra.mxu0 %v1222_v5 }
  0x5d   :  { %1118 = vmatprep.subr.bf16.mxu0 %v1263_v42 }
  0x5e   :  { %1137 = vmatpush3.bf16.msra.mxu1 %v1230_v13 }
  0x5f   :  { %1138 = vmatprep.subr.bf16.mxu1 %v1263_v42 }
  0x60   :  { %1119 = vmatpush3.bf16.msra.mxu0 %v1223_v6 }
  0x61   :  { %1120 = vmatprep.subr.bf16.mxu0 %v1263_v42 }
  0x62   :  { %1139 = vmatpush3.bf16.msra.mxu1 %v1231_v14 }
  0x63   :  { %1140 = vmatprep.subr.bf16.mxu1 %v1263_v42 }
  0x64   :  { %1121 = vmatpush3.bf16.msra.mxu0 %v1224_v7 }
  0x65   :  { %1122 = vmatprep.subr.bf16.mxu0 %v1263_v42 }
  0x66   :  { %1141 = vmatpush3.bf16.msra.mxu1 %v1232_v15 }
  0x67   :  { %1142 = vmatprep.subr.bf16.mxu1 %v1263_v42 }
  0x68   :  { %1123 = vmatpush3.bf16.msra.mxu0 %v1225_v8 }
  0x69   :  { %1124 = vmatprep.subr.bf16.mxu0 %v1263_v42 }
  0x6a   :  { %1143 = vmatpush3.bf16.msra.mxu1 %v1233_v16 }
  0x6b   :  { %1144 = vmatprep.subr.bf16.mxu1 %v1263_v42 }
  0x6c   :  { %1125 = vmatpush3.bf16.msra.mxu0 %v1226_v9 }
  0x6d   :  { %1126 = vmatprep.subr.bf16.mxu0 %v1263_v42 }
  0x6e   :  { %1145 = vmatpush3.bf16.msra.mxu1 %v1234_v44 }
  0x6f   :  { %1146 = vmatprep.subr.bf16.mxu1 %v1263_v42  ;;  %v990_v42 = vld [vmem:[%s1425_s6] ss:$0 sm:$0xff] }
  0x70   :  { %1127 = vmatpush3.bf16.msra.mxu0 %v1227_v10 }
  0x72   :  { %1147 = vmatpush3.bf16.msra.mxu1 %v1235_v45 }
 0x106   :  { %v1015_v17 = vpop.f32.mrb[0].mxu0 }
 0x107   :  { %v1016_v19 = vpop.f32.mrb[1].mxu0 }
 0x108   :  { %v1017_v20 = vadd.f32 %v1016_v19, %v1015_v17  ;;  %v1018_v21 = vpop.f32.mrb[2].mxu0  ;;  %v1037_v22 = vpop.f32.mrb[0].mxu1 }
 0x109   :  { %v1019_v23 = vpop.f32.mrb[3].mxu0  ;;  %v1038_v24 = vpop.f32.mrb[1].mxu1 }
 0x10a   :  { %v560_v25 = vadd.f32 %v1017_v20, %v917_v18  ;;  %v1039_v26 = vadd.f32 %v1038_v24, %v1037_v22  ;;  %v1040_v27 = vpop.f32.mrb[2].mxu1 }
 0x10b   :  { %v1041_v28 = vpop.f32.mrb[3].mxu1 }
 0x10c   :  { %v600_v29 = vadd.f32 %v1039_v26, %v560_v25 }
 0x126   :  { %v1059_v30 = vpop.f32.mrb[4].mxu0 }
 0x127   :  { %v1060_v31 = vpop.f32.mrb[5].mxu0 }
 0x128   :  { %v1061_v32 = vadd.f32 %v1060_v31, %v1059_v30  ;;  %v1062_v33 = vpop.f32.mrb[6].mxu0  ;;  %v679_v34 = vpop.f32.mrb[4].mxu1 }
 0x129   :  { %v1063_v35 = vpop.f32.mrb[7].mxu0  ;;  %v1110_v36 = vpop.f32.mrb[5].mxu1 }
 0x12a   :  { %v640_v37 = vadd.f32 %v1061_v32, %v600_v29  ;;  %v682_v38 = vpop.f32.mrb[6].mxu1 }
 0x12b   :  { %v1111_v39 = vpop.f32.mrb[7].mxu1 }
 0x12c   :  { %v680_v40 = vadd.f32 %v679_v34, %v640_v37 }
 0x12e   :  { %v685_v41 = vmax.f32 %v680_v40, 0.0 }
 0x130   :  { %v686_v43 = vpack.c.bf16 %v685_v41, %v685_v41 }
 0x132   :  { %1129 = vmatmul.mubr.bf16.vlgmr.msra.gmra.mrb[8].mxu0 %v686_v43 }
 0x205   :  { %v792_v47 = vpop.f32.mrb[8].mxu0 }
 0x206   :  { %v793_v48 = vadd.f32 %v981_v46, %v792_v47  ;;  %v1130_v49 = vpop.f32.mrb[9].mxu0 }
 0x207   :  { %v795_v50 = vpop.f32.mrb[10].mxu0 }
 0x208   :  { %v798_v51 = vmax.f32 %v793_v48, 0.0  ;;  %v1131_v52 = vpop.f32.mrb[11].mxu0 }
 0x20a   :  { %v799_v53 = vpack.c.bf16 %v798_v51, %v798_v51 }
 0x20c   :  { %1149 = vmatmul.mubr.bf16.vlgmr.msra.gmra.mrb[8].mxu1 %v799_v53 }
 0x2df   :  { %v905_v54 = vpop.f32.mrb[8].mxu1 }
 0x2e0   :  { %v906_v55 = vadd.f32 %v990_v42, %v905_v54  ;;  %v1150_v56 = vpop.f32.mrb[9].mxu1 }
 0x2e1   :  { %v908_v57 = vpop.f32.mrb[10].mxu1 }
 0x2e2   :  { %911 = vst [vmem:[%s1426_s7] sm:$0xff] %v906_v55  ;;  %v1151_v58 = vpop.f32.mrb[11].mxu1 }
 0x2e3   :  { %916 = vsyncpa [#allocation3], 1 }

</bundles_post_ra>
